<compile_context>
chip_gen: v5e
topology: v5e:2x2
jax: 0.10.0
libtpu: 0.0.40
codegen_flags: <defaults>
</compile_context>

<pallas_src>
import math

import jax
import jax.numpy as jnp
from jax.experimental import pallas as pl
from jax.experimental.pallas import tpu as pltpu


def _round_up(x, m):
    return (x + m - 1) // m * m


def _vmem_capacity_bytes():
    """Physical VMEM of the current part; conservative fallback = v7x per-TC 64 MiB."""
    cap = 64 * 1024 * 1024
    try:
        info = pltpu.get_tpu_info()
        cap = int(getattr(info, "vmem_capacity_bytes", cap))
    except Exception:
        pass
    return cap


def _choose_tn(n, c, p, e_pad, x_itemsize, out_itemsize, budget_bytes, batch):
    """Largest patch-axis tile that fits the VMEM budget.

    Accounts for (8,128) lane padding of the (C, tn, P) input tile, double
    buffering of input/output, the resident bf16 weight, and the f32 accumulator
    values.  Returns either the full dim (always a legal block) or a multiple of
    8 (legal as the second-minor block dim); the grid uses cdiv so tn need not
    divide N.
    """
    p_pad = _round_up(p, 128)                       # lane padding of the x tile
    per_row = (2 * c * p_pad * x_itemsize           # 2x input buffers
               + 2 * e_pad * out_itemsize           # 2x output buffers
               + e_pad * 4)                         # f32 accumulator live values
    fixed = 2 * c * p * e_pad * 2 + 2 * 8 * e_pad * 4   # resident weight (bf16) + bias
    cap = (budget_bytes - fixed) // max(per_row, 1)
    cap = max(8, min(cap, 2048))
    if batch == 1:
        # v7x has 2 TensorCores; keep >= 2 parallel tiles so neither sits idle.
        cap = min(cap, max(8, _round_up(n, 2) // 2))
    if n <= cap:
        return n                                    # full dim is always legal
    return cap - cap % 8                            # multiple of 8 satisfies (8,128)


def _patch_embed_kernel(x_ref, w_ref, b_ref, o_ref):
    # x_ref: (C, tn, P)     input patches tile, all channels
    # w_ref: (C, P, E_pad)  bf16 weight, fully resident in VMEM (constant index map)
    # b_ref: (1, E_pad)     f32 bias
    # o_ref: (tn, E_pad)    output tile
    C, tn, _ = x_ref.shape
    e_pad = o_ref.shape[-1]

    # Bias folded into the accumulator init; f32 accumulation throughout.
    acc = jnp.broadcast_to(b_ref[...], (tn, e_pad))
    # Unrolled channel reduction (C is small and static).
    # TODO(synk): a single K=C*P dot would feed the 256-wide v7x MXU better, but
    # needs an in-kernel (C,tn,P)->(tn,C*P) relayout; per-channel dots kept for
    # robust lowering.
    for c in range(C):
        acc = acc + jnp.dot(
            x_ref[c].astype(jnp.bfloat16),
            w_ref[c],
            preferred_element_type=jnp.float32,
        )
    o_ref[...] = acc.astype(o_ref.dtype)


def patch_embed(x, weight, bias, patch_size, out_dtype=None, return_padded=False):
    """1D PatchEmbed forward.

    x:      (B, C, L)  (NCL, like PyTorch Conv1d input)
    weight: (E, C, P)  Conv1d weight
    bias:   (E,)       Conv1d bias
    returns (B, L // P, E)  == proj(x).transpose(1, 2)
            (or (B, N, E_pad) with zero-padded extra columns if return_padded)
    """
    B, C, L = x.shape
    E = weight.shape[0]
    P = patch_size
    N = L // P                          # num_patches (Conv1d stride semantics)
    if L != N * P:                      # drop ragged tail explicitly, like Conv1d
        x = x[:, :, : N * P]
    out_dtype = x.dtype if out_dtype is None else out_dtype

    E_pad = _round_up(E, 128)           # lane-dense stores / full MXU tiles

    # Free reshape only (no transpose, no extra HBM traffic on x).
    x4 = x.reshape(B, C, N, P)

    # Weight/bias prep is on tiny tensors (E*C*P elements) -> negligible cost.
    w = jnp.transpose(weight, (1, 2, 0)).astype(jnp.bfloat16)     # (C, P, E)
    if E_pad != E:
        w = jnp.pad(w, ((0, 0), (0, 0), (0, E_pad - E)))          # (C, P, E_pad)
    b = jnp.pad(bias.astype(jnp.float32), (0, E_pad - E)).reshape(1, E_pad)

    vmem_cap = _vmem_capacity_bytes()
    vmem_limit = int(vmem_cap * 0.75)            # 96 MiB on 128 MiB parts, 48 MiB on v7x
    tn = _choose_tn(
        N, C, P, E_pad,
        jnp.dtype(x.dtype).itemsize, jnp.dtype(out_dtype).itemsize,
        int(vmem_limit * 0.9), B,
    )
    NT = pl.cdiv(N, tn)                          # ragged N handled by partial blocks

    out = pl.pallas_call(
        _patch_embed_kernel,
        out_shape=jax.ShapeDtypeStruct((B, N, E_pad), out_dtype),
        grid=(B, NT),
        in_specs=[
            # x4[b, :, j*tn:(j+1)*tn, :]  -> kernel sees (C, tn, P)
            pl.BlockSpec((None, C, tn, P), lambda bi, j: (bi, 0, j, 0)),
            # full weight, constant index map -> fetched from HBM once, resident
            pl.BlockSpec((C, P, E_pad), lambda bi, j: (0, 0, 0)),
            # bias -> (1, E_pad), constant index map
            pl.BlockSpec((1, E_pad), lambda bi, j: (0, 0)),
        ],
        out_specs=pl.BlockSpec((None, tn, E_pad), lambda bi, j: (bi, j, 0)),
        compiler_params=pltpu.CompilerParams(
            dimension_semantics=("parallel", "parallel"),
            vmem_limit_bytes=vmem_limit,
        ),
    )(x4, w, b)

    if E_pad != E and not return_padded:
        # Padded columns are exactly zero; consumers that accept E_pad columns
        # can pass return_padded=True and skip this extra pass over the output.
        out = out[..., :E]
    return out


def init_patch_embed_params(key, seq_len, patch_size, in_channels, embed_dim):
    """Deterministic init matching nn.Conv1d default (uniform(-b, b), b=1/sqrt(C*K))."""
    k_w, k_b = jax.random.split(key)
    fan_in = in_channels * patch_size
    bound = 1.0 / math.sqrt(fan_in)
    weight = jax.random.uniform(
        k_w, (embed_dim, in_channels, patch_size), jnp.float32, -bound, bound
    )
    bias = jax.random.uniform(k_b, (embed_dim,), jnp.float32, -bound, bound)
    return weight, bias


if __name__ == "__main__":
    # Small shapes consistent with the module: B=2, C=4, seq_len=16, patch=4, E=32
    B, C, L, P, E = 2, 4, 16, 4, 32

    key = jax.random.PRNGKey(0)
    k_x, k_params = jax.random.split(key)
    x = jax.random.normal(k_x, (B, C, L), jnp.float32)
    weight, bias = init_patch_embed_params(k_params, L, P, C, E)

    out = patch_embed(x, weight, bias, P)
    out = jax.block_until_ready(out)

    N = L // P
    assert out.shape == (B, N, E), out.shape

    # Reference with matching bf16 matmul operands + f32 accumulation.
    ref = jnp.einsum(
        "bcnp,ecp->bne",
        x.reshape(B, C, N, P).astype(jnp.bfloat16).astype(jnp.float32),
        weight.astype(jnp.bfloat16).astype(jnp.float32),
    ) + bias[None, None, :]
    assert jnp.allclose(out, ref, atol=1e-4, rtol=1e-4)

    # Looser sanity check against the pure-f32 reference.
    ref_f32 = jnp.einsum(
        "bcnp,ecp->bne", x.reshape(B, C, N, P), weight
    ) + bias[None, None, :]
    assert jnp.allclose(out, ref_f32, atol=5e-2, rtol=5e-2)

    print("KERNEL_OK")
</pallas_src>

<mosaic_0001>
module attributes {stable_mosaic.version = 11 : i64} {
  func.func @_patch_embed_kernel(%arg0: i32, %arg1: i32, %arg2: memref<1x4x4x4xf32, #tpu.memory_space<vmem>>, %arg3: memref<4x4x128xbf16, #tpu.memory_space<vmem>>, %arg4: memref<1x128xf32, #tpu.memory_space<vmem>>, %arg5: memref<1x4x128xf32, #tpu.memory_space<vmem>>) attributes {dimension_semantics = [#tpu.dimension_semantics<parallel>, #tpu.dimension_semantics<parallel>], iteration_bounds = array<i64: 2, 1>, scalar_prefetch = 0 : i64, scratch_operands = 0 : i64, tpu.core_type = #tpu.core_type<tc>, window_params = [{transform_indices = @transform_0, window_bounds = array<i64: 1, 4, 4, 4>}, {pipeline_mode = #tpu.pipeline_mode<synchronous>, transform_indices = @transform_1, window_bounds = array<i64: 4, 4, 128>}, {pipeline_mode = #tpu.pipeline_mode<synchronous>, transform_indices = @transform_2, window_bounds = array<i64: 1, 128>}, {transform_indices = @transform_3, window_bounds = array<i64: 1, 4, 128>}]} {
    %c0 = arith.constant 0 : index
    %c0_0 = arith.constant 0 : index
    %0 = vector.load %arg4[%c0, %c0_0] : memref<1x128xf32, #tpu.memory_space<vmem>>, vector<1x128xf32>
    %1 = vector.shape_cast %0 : vector<1x128xf32> to vector<1x128xf32>
    %2 = vector.broadcast %1 : vector<1x128xf32> to vector<4x128xf32>
    %c0_1 = arith.constant 0 : index
    %c0_2 = arith.constant 0 : index
    %c0_3 = arith.constant 0 : index
    %c0_4 = arith.constant 0 : index
    %3 = vector.load %arg2[%c0_1, %c0_2, %c0_3, %c0_4] : memref<1x4x4x4xf32, #tpu.memory_space<vmem>>, vector<1x1x4x4xf32>
    %4 = vector.shape_cast %3 : vector<1x1x4x4xf32> to vector<4x4xf32>
    %5 = arith.truncf %4 : vector<4x4xf32> to vector<4x4xbf16>
    %c0_5 = arith.constant 0 : index
    %c0_6 = arith.constant 0 : index
    %c0_7 = arith.constant 0 : index
    %6 = vector.load %arg3[%c0_5, %c0_6, %c0_7] : memref<4x4x128xbf16, #tpu.memory_space<vmem>>, vector<1x4x128xbf16>
    %7 = vector.shape_cast %6 : vector<1x4x128xbf16> to vector<4x128xbf16>
    %cst = arith.constant dense<0.000000e+00> : vector<4x128xf32>
    %8 = tpu.matmul %5, %7, %cst {dimension_numbers = #tpu.dot_dimension_numbers<[1], [0], [0], [1], [0, 0, 1, 1], [], []>} : vector<4x4xbf16>, vector<4x128xbf16>, vector<4x128xf32> -> vector<4x128xf32>
    %9 = arith.addf %2, %8 : vector<4x128xf32>
    %c0_8 = arith.constant 0 : index
    %c1 = arith.constant 1 : index
    %c0_9 = arith.constant 0 : index
    %c0_10 = arith.constant 0 : index
    %10 = vector.load %arg2[%c0_8, %c1, %c0_9, %c0_10] : memref<1x4x4x4xf32, #tpu.memory_space<vmem>>, vector<1x1x4x4xf32>
    %11 = vector.shape_cast %10 : vector<1x1x4x4xf32> to vector<4x4xf32>
    %12 = arith.truncf %11 : vector<4x4xf32> to vector<4x4xbf16>
    %c1_11 = arith.constant 1 : index
    %c0_12 = arith.constant 0 : index
    %c0_13 = arith.constant 0 : index
    %13 = vector.load %arg3[%c1_11, %c0_12, %c0_13] : memref<4x4x128xbf16, #tpu.memory_space<vmem>>, vector<1x4x128xbf16>
    %14 = vector.shape_cast %13 : vector<1x4x128xbf16> to vector<4x128xbf16>
    %cst_14 = arith.constant dense<0.000000e+00> : vector<4x128xf32>
    %15 = tpu.matmul %12, %14, %cst_14 {dimension_numbers = #tpu.dot_dimension_numbers<[1], [0], [0], [1], [0, 0, 1, 1], [], []>} : vector<4x4xbf16>, vector<4x128xbf16>, vector<4x128xf32> -> vector<4x128xf32>
    %16 = arith.addf %9, %15 : vector<4x128xf32>
    %c0_15 = arith.constant 0 : index
    %c2 = arith.constant 2 : index
    %c0_16 = arith.constant 0 : index
    %c0_17 = arith.constant 0 : index
    %17 = vector.load %arg2[%c0_15, %c2, %c0_16, %c0_17] : memref<1x4x4x4xf32, #tpu.memory_space<vmem>>, vector<1x1x4x4xf32>
    %18 = vector.shape_cast %17 : vector<1x1x4x4xf32> to vector<4x4xf32>
    %19 = arith.truncf %18 : vector<4x4xf32> to vector<4x4xbf16>
    %c2_18 = arith.constant 2 : index
    %c0_19 = arith.constant 0 : index
    %c0_20 = arith.constant 0 : index
    %20 = vector.load %arg3[%c2_18, %c0_19, %c0_20] : memref<4x4x128xbf16, #tpu.memory_space<vmem>>, vector<1x4x128xbf16>
    %21 = vector.shape_cast %20 : vector<1x4x128xbf16> to vector<4x128xbf16>
    %cst_21 = arith.constant dense<0.000000e+00> : vector<4x128xf32>
    %22 = tpu.matmul %19, %21, %cst_21 {dimension_numbers = #tpu.dot_dimension_numbers<[1], [0], [0], [1], [0, 0, 1, 1], [], []>} : vector<4x4xbf16>, vector<4x128xbf16>, vector<4x128xf32> -> vector<4x128xf32>
    %23 = arith.addf %16, %22 : vector<4x128xf32>
    %c0_22 = arith.constant 0 : index
    %c3 = arith.constant 3 : index
    %c0_23 = arith.constant 0 : index
    %c0_24 = arith.constant 0 : index
    %24 = vector.load %arg2[%c0_22, %c3, %c0_23, %c0_24] : memref<1x4x4x4xf32, #tpu.memory_space<vmem>>, vector<1x1x4x4xf32>
    %25 = vector.shape_cast %24 : vector<1x1x4x4xf32> to vector<4x4xf32>
    %26 = arith.truncf %25 : vector<4x4xf32> to vector<4x4xbf16>
    %c3_25 = arith.constant 3 : index
    %c0_26 = arith.constant 0 : index
    %c0_27 = arith.constant 0 : index
    %27 = vector.load %arg3[%c3_25, %c0_26, %c0_27] : memref<4x4x128xbf16, #tpu.memory_space<vmem>>, vector<1x4x128xbf16>
    %28 = vector.shape_cast %27 : vector<1x4x128xbf16> to vector<4x128xbf16>
    %cst_28 = arith.constant dense<0.000000e+00> : vector<4x128xf32>
    %29 = tpu.matmul %26, %28, %cst_28 {dimension_numbers = #tpu.dot_dimension_numbers<[1], [0], [0], [1], [0, 0, 1, 1], [], []>} : vector<4x4xbf16>, vector<4x128xbf16>, vector<4x128xf32> -> vector<4x128xf32>
    %30 = arith.addf %23, %29 : vector<4x128xf32>
    %c0_29 = arith.constant 0 : index
    %c0_30 = arith.constant 0 : index
    %c0_31 = arith.constant 0 : index
    %31 = vector.load %arg5[%c0_29, %c0_30, %c0_31] : memref<1x4x128xf32, #tpu.memory_space<vmem>>, vector<1x4x128xf32>
    %32 = vector.shape_cast %31 : vector<1x4x128xf32> to vector<4x128xf32>
    %33 = vector.shape_cast %30 : vector<4x128xf32> to vector<1x4x128xf32>
    tpu.vector_store %arg5[%c0_29, %c0_30, %c0_31], %33 {strides = array<i32>} : memref<1x4x128xf32, #tpu.memory_space<vmem>>, vector<1x4x128xf32>,
    return
  }
  func.func @transform_0(%arg0: i32, %arg1: i32) -> (i32, i32, i32, i32) {
    %c0_i32 = arith.constant 0 : i32
    %c0_i32_0 = arith.constant 0 : i32
    %c0_i32_1 = arith.constant 0 : i32
    return %arg0, %c0_i32, %arg1, %c0_i32_0 : i32, i32, i32, i32
  }
  func.func @transform_1(%arg0: i32, %arg1: i32) -> (i32, i32, i32) {
    %c0_i32 = arith.constant 0 : i32
    %c0_i32_0 = arith.constant 0 : i32
    %c0_i32_1 = arith.constant 0 : i32
    %c0_i32_2 = arith.constant 0 : i32
    return %c0_i32, %c0_i32_0, %c0_i32_1 : i32, i32, i32
  }
  func.func @transform_2(%arg0: i32, %arg1: i32) -> (i32, i32) {
    %c0_i32 = arith.constant 0 : i32
    %c0_i32_0 = arith.constant 0 : i32
    %c0_i32_1 = arith.constant 0 : i32
    return %c0_i32, %c0_i32_0 : i32, i32
  }
  func.func @transform_3(%arg0: i32, %arg1: i32) -> (i32, i32, i32) {
    %c0_i32 = arith.constant 0 : i32
    %c0_i32_0 = arith.constant 0 : i32
    return %arg0, %arg1, %c0_i32 : i32, i32, i32
  }
}

</mosaic_0001>

<bundles_post_ra>
// kernel: tpu_custom_call.1
= control target key start
LH: loop header
LB: loop body
LE: loop exit
PB: predicated region body
PF: predicated region fallthrough
CT: control target
= control target key end

     0   :  { %s867_s0 = inlined_call_operand.hbm [shape: f32[2,4,4,4], index: 0, kind: input, shape index: {}]   ;;  %s868_s1 = inlined_call_operand.hbm [shape: bf16[4,4,128], index: 1, kind: input, shape index: {}]   ;;  %s869_s2 = inlined_call_operand.vmem [shape: f32[1,128], index: 2, kind: input, shape index: {}]   ;;  %s870_s3 = inlined_call_operand.hbm [shape: f32[2,4,128], index: 3, kind: output, shape index: {}]  }
   0x1   :  { %871 = sst [smem:[#allocation11_spill]] %s868_s1 }
   0x2   :  { %8 = vsyncpa [#allocation3], 0 }
   0x3   :  { %10 = vsyncpa [#allocation3 + $0x1], 0 }
   0x4   :  { %11 = vsyncpa [#allocation6], 0 }
   0x5   :  { %12 = vsyncpa [#allocation4], 0 }
   0x6   :  { %14 = vsyncpa [#allocation4 + $0x1], 0  ;;  %s714_s12 = smov 0   ;;  %s716_s13 = smov 0  }
   0x7   :  { %s718_s14 = smov 0   ;;  %s720_s15 = smov 0  }
   0x8   :  { %s722_s16 = smov 0   ;;  %s724_s17 = smov 0  }
   0x9 LB: > { %s439_s18 = sadd.s32 4294967295, %s687_s17   ;;  %s440_s19 = sadd.s32 4294967294, %s687_s17   ;;  %s687_s17 = sphi %s724_s17, %s20_s17   ;;  %s683_s16 = sphi %s722_s16, %s884_s16   ;;  %s679_s15 = sphi %s720_s15, %s883_s15   ;;  %s675_s14 = sphi %s718_s14, %s882_s14   ;;  %s671_s13 = sphi %s716_s13, %s881_s13   ;;  %s667_s12 = sphi %s714_s12, %s880_s12  }
   0xa   : > { %p54_p0 = scmp.ne.s32.totalorder %s671_s13, %s667_s12  ;;  %p748_p1 = scmp.eq.s32.totalorder %s439_s18, 0 }
   0xb   : > { %p752_p2 = scmp.eq.s32.totalorder %s439_s18, 1  ;;  %p128_p3 = scmp.eq.s32.totalorder %s440_s19, 1 }
   0xc   : > { %p758_p4 = por %p748_p1, %p54_p0  ;;  %p441_p5 = scmp.ge.s32.totalorder %s687_s17, 1 }
   0xd   : > { %p763_p6 = por %p128_p3, %p54_p0  ;;  %p135_p7 = scmp.lt.s32.totalorder %s687_s17, 3 }
   0xe   : > { %s876_s1 = sld [smem:[#allocation11_spill]]  ;;  %s689_s28 = smov [#allocation5]  }
   0xf   : > { %p771_p8 = pnand %p441_p5, %p135_p7  ;;  %s148_s29 = sshll.u32 %s689_s28, 4  ;;  %s149_s29 = int_to_ptr.vmem [resolvable:$true] %s148_s29 }
  0x10   : > { %p443_p11 = scmp.ge.s32.totalorder %s687_s17, 2  ;;  %s690_s30 = smov 32  }
  0x11   : > { %p471_p9 = pneg %p771_p8  ;;  %s691_s4 = smov 2  }
  0x12   : > { %s32_s5 = sadd.s32 1, %s683_s16  ;;  %s41_s6 = sadd.s32 1, %s675_s14 }
  0x13   : > { %p472_p10 = pnand %p471_p9, %p748_p1  ;;  %p34_p12 = scmp.ge.s32.totalorder %s32_s5, 2 }
  0x14   : > { %s146_s26 = sshll.u32 %s876_s1, 4  ;;  %p48_p13 = scmp.ne.s32.totalorder %s675_s14, %s671_s13  ;;  %s147_s26 = int_to_ptr.hbm [resolvable:$true] %s146_s26 }
  0x15   : > { %474 = dma.hbm_to_vmem [thread:$0]  (!%p472_p10), %s147_s26, 128, %s149_s29, [#allocation6], %s690_s30, %s690_s30, %s691_s4  }
  0x16   : > { %p49_p0 = scmp.eq.s32.totalorder %s687_s17, 0  ;;  %s886_s5 = smov (%p34_p12, %s32_s5), 0 }
  0x17   : > { %p793_p5 = por %p752_p2, %p48_p13  ;;  %s36_s9 = ssub.s32 %s683_s16, %s886_s5 }
  0x18   : > { %p787_p3 = por %p49_p0, %p48_p13  ;;  %p484_p7 = scmp.lt.s32.totalorder %s687_s17, 2 }
  0x19   : > { %p39_p9 = scmp.eq.s32.totalorder %s36_s9, 0  ;;  %s165_s10 = sand.u32 1, %s675_s14  }
  0x1a   : > { %s444_s11 = sshll.u32 %s165_s10, 4  ;;  %s462_s19 = sshll.u32 %s683_s16, 4 }
  0x1b   : > { %s802_s18 = scalar_select %p39_p9, %s675_s14, %s41_s6  }
  0x1c   : > { %s175_s26 = scalar_lea.hbm %s867_s0, %s462_s19  ;;  %s169_s28 = scalar_lea.vmem [#allocation2], %s444_s11 }
  0x1d   : > { %s178_s29 = sshll.u32 %s169_s28, 4  ;;  %s176_s21 = sshll.u32 %s175_s26, 4  ;;  %s179_s29 = int_to_ptr.vmem [resolvable:$true] %s178_s29  ;;  %s177_s21 = int_to_ptr.hbm [resolvable:$true] %s176_s21 }
  0x1e   : > { %p476_p2 = pnand %p484_p7, %p787_p3  ;;  %s166_s30 = scalar_lea.sflag [#allocation3], %s165_s10 }
  0x1f   : > { %s692_s4 = smov 64   ;;  %s693_s1 = smov 4  }
  0x20   : > { %478 = dma.hbm_to_vmem [thread:$0]  (!%p476_p2), %s177_s21, 256, %s179_s29, %s166_s30, %s692_s4, %s692_s4, %s693_s1  }
  0x21   : > { %190 = sbr.rel (%p771_p8) target bundleno = 188 (0xbc), region = 32  ;;  %s813_s6 = sand.u32 (!%p771_p8), 1, %s671_s13  }
  0x22   : > { %s448_s9 = sshll.u32 (!%p771_p8), %s813_s6, 4  ;;  %s193_s11 = scalar_lea.sflag (!%p771_p8), [#allocation3], %s813_s6 }
  0x23   : > { %s196_s19 = scalar_lea.vmem (!%p771_p8), [#allocation2], %s448_s9 }
  0x26   : > { %654 = dma.done.wait (%p758_p4), %s193_s11, 256  }
  0x27   : > { %656 = vsyncadd (%p758_p4), %s193_s11, 4294967040 }
  0x28   : > { %658 = dma.done.wait (%p748_p1), [#allocation6], 128  }
  0x29   : > { %660 = vsyncadd (%p748_p1), [#allocation6], 4294967168  ;;  %vm237_vm0 = vcmask 1041408   ;;  %v232_v0 = vld [vmem:[#allocation5] sm:$0x3]  ;;  %vm233_vm1 = vcmask 31744  }
  0x2a   : > { %v259_v1 = vld [vmem:[#allocation5 + $0x2] sm:$0x3]  ;;  %v284_v2 = vld [vmem:[#allocation5 + $0x4] sm:$0x3]  ;;  %v239_v3 = vsel %vm237_vm0, %v232_v0, 0  ;;  %s450_s22 = sshll.u32 %s813_s6, 2 }
  0x2b   : > { %v264_v4 = vsel %vm237_vm0, %v259_v1, 0  ;;  %v289_v5 = vsel %vm237_vm0, %v284_v2, 0  ;;  %v309_v6 = vld [vmem:[#allocation5 + $0x6] sm:$0x3]  ;;  %248 = vmatpush.bf16.msra.mxu0 %v239_v3  ;;  %v230_v8 = vld [vmem:[%s196_s19] sm:$0xf] }
  0x2c   : > { %273 = vmatpush.bf16.msra.mxu1 %v264_v4  ;;  %v314_v7 = vsel %vm237_vm0, %v309_v6, 0  ;;  %v452_v9 = vld [vmem:[%s196_s19 + $0x4] sm:$0xf]  ;;  %298 = vmatpush.bf16.msra.mxu2 %v289_v5  ;;  %v231_v10 = vpack.c.bf16 %v230_v8, %v230_v8  ;;  %v454_v12 = vld [vmem:[%s196_s19 + $0x8] sm:$0xf]  ;;  %s459_s27 = sshll.u32 %s679_s15, 2 }
  0x2d   : > { %323 = vmatpush.bf16.msra.mxu3 %v314_v7  ;;  %v257_v11 = vpack.c.bf16 %v452_v9, %v452_v9  ;;  %v456_v13 = vld [vmem:[%s196_s19 + $0xc] sm:$0xf]  ;;  %v282_v14 = vpack.c.bf16 %v454_v12, %v454_v12  ;;  %v540_v16 = vld [vmem:[%s869_s2] ss:$0 sm:$0xff]  ;;  %s343_s24 = scalar_lea.hbm %s870_s3, %s459_s27  ;;  %s224_s25 = scalar_lea.vmem [#allocation7], %s450_s22 }
  0x2e   : > { %v307_v15 = vpack.c.bf16 %v456_v13, %v456_v13  ;;  %451 = vmatmul.msk.bf16.vlgmr.msra.gmra.mxu0 %vm233_vm1, %v231_v10  ;;  %s345_s26 = sshll.u32 %s224_s25, 4  ;;  %s347_s28 = sshll.u32 %s343_s24, 4  ;;  %s346_s26 = int_to_ptr.vmem [resolvable:$true] %s345_s26  ;;  %s348_s28 = int_to_ptr.hbm [resolvable:$true] %s347_s28 }
  0x2f   : > { %453 = vmatmul.msk.bf16.vlgmr.msra.gmra.mxu1 %vm233_vm1, %v257_v11  ;;  %455 = vmatmul.msk.bf16.vlgmr.msra.gmra.mxu2 %vm233_vm1, %v282_v14  ;;  %s332_s29 = scalar_lea.sflag [#allocation4], %s813_s6  ;;  %s615_s15 = sshra.s32 %s348_s28, 4  ;;  %s616_s15 = int_to_ptr.hbm [resolvable:$true] %s615_s15 }
  0x30   : > { %457 = vmatmul.msk.bf16.vlgmr.msra.gmra.mxu3 %vm233_vm1, %v307_v15  ;;  %s617_s21 = scalar_lea.hbm %s616_s15, 4  ;;  %s621_s9 = scalar_lea.hbm %s870_s3, 8 }
  0x31   : > { %p618_p1 = scmp.ne.s32.totalorder %s616_s15, %s617_s21  ;;  %p622_p10 = scmp.lt.s32.totalorder %s616_s15, %s870_s3 }
  0x32   : > { %p623_p12 = scmp.lt.s32.totalorder %s621_s9, %s617_s21 }
  0x33   : > { %p619_p4 = pnand %p618_p1, %p793_p5 }
  0x34   : > { %p624_p13 = por %p623_p12, %p622_p10 }
  0x35   : > { %p620_p8 = pneg %p619_p4 }
  0x37   : > { %p625_p0 = pnand %p624_p13, %p620_p8 }
  0xab   : > { %v250_v17 = vpop.f32.mrf.mxu0 }
  0xac   : > { %v275_v18 = vpop.f32.mrf.mxu1  ;;  %v254_v19 = vadd.f32 %v540_v16, %v250_v17 }
  0xae   : > { %v279_v20 = vadd.f32 %v275_v18, %v254_v19 }
  0xb2   : > { %v300_v21 = vpop.f32.mrf.mxu2 }
  0xb3   : > { %v325_v22 = vpop.f32.mrf.mxu3  ;;  %v304_v23 = vadd.f32 %v300_v21, %v279_v20  ;;  %v252_v24 = vpop.f32.mrf.mxu0 }
  0xb4   : > { %v277_v25 = vpop.f32.mrf.mxu1 }
  0xb5   : > { %v329_v26 = vadd.f32 %v325_v22, %v304_v23 }
  0xb7   : > { %330 = vst [vmem:[%s224_s25] sm:$0xf] %v329_v26 }
  0xb8   : > { %628 = shalt.err (!%p625_p0)
}
  0xb9   : > { %469 = dma.vmem_to_hbm [thread:$0]  (%p793_p5), %s346_s26, 64, %s348_s28, %s332_s29  }
  0xba   : > { %v302_v27 = vpop.f32.mrf.mxu2 }
  0xbb   : > { %v327_v28 = vpop.f32.mrf.mxu3 }
  0xbc PF: > { %s359_s6 = sand.u32 1, %s667_s12   ;;  %p480_p3 = pnand %p443_p11, %p763_p6 }
  0xbd   : > { %s360_s1 = scalar_lea.sflag [#allocation4], %s359_s6 }
  0xbe   : > { %p481_p7 = pneg %p480_p3 }
  0xc0   : > { %662 = dma.done.wait (%p481_p7), %s360_s1, 64  }
  0xc1   : > { %664 = vsyncadd (%p481_p7), %s360_s1, 4294967232  ;;  %s20_s17 = sadd.s32 1, %s687_s17   ;;  %s880_s12 = smov %s671_s13 }
  0xc2   : > { %p17_p9 = scmp.ge.s32.totalorder %s20_s17, 4   ;;  %s881_s13 = smov %s675_s14 }
  0xc3   : > { %s882_s14 = smov %s802_s18  ;;  %s883_s15 = smov %s683_s16 }
  0xc4   : > { %s884_s16 = smov %s886_s5  ;;  %19 = sbr.rel (!%p17_p9) target bundleno = 9 (0x9), region = 87 }
  0xc9   :  { %366 = vsyncpa [#allocation3], 1 }
  0xca   :  { %368 = vsyncpa [#allocation3 + $0x1], 1 }
  0xcb   :  { %369 = vsyncpa [#allocation6], 1 }
  0xcc   :  { %370 = vsyncpa [#allocation4], 1 }
  0xcd   :  { %372 = vsyncpa [#allocation4 + $0x1], 1 }

</bundles_post_ra>
